<compile_context>
chip_gen: v5e
topology: v5e:2x2
jax: 0.10.0
libtpu: 0.0.40
codegen_flags: <defaults>
</compile_context>

<pallas_src>
import jax
import jax.numpy as jnp
import numpy as np
from jax.experimental import pallas as pl
from jax.experimental.pallas import tpu as pltpu


def _round_up(x, m):
    return (x + m - 1) // m * m


def _pad2(x, rows, cols, dtype=None):
    x = jnp.asarray(x)
    out = jnp.pad(x, ((0, rows - x.shape[0]), (0, cols - x.shape[1])))
    return out.astype(dtype) if dtype is not None else out


def _decoder_kernel(x_ref, hid_ref, w_rz_ref, w_in_ref, w_hn_ref,
                    b_rz_ref, b_n_ref, w_fc_ref, b_fc_ref,
                    out_ref, feat_ref):
    """One O-tile of logits.

    On the first grid step the GRU cell is evaluated once and the fused feature
    operand feat = [emb | ctx | h_new] (bf16) is written into the persistent
    VMEM scratch `feat_ref`; every tile then does a single MXU dot against its
    streamed (Kp, tO) slice of the fused fc weight matrix.
    """
    Hp = hid_ref.shape[1]
    Kp = x_ref.shape[1]
    Ep = Kp - 2 * Hp

    @pl.when(pl.program_id(0) == 0)
    def _():
        x = x_ref[...]                                     # (Bp, Kp) bf16  [emb|ctx|hid]
        hid_f32 = hid_ref[...]                             # (Bp, Hp) f32

        # r and z gates in one dot (columns [r | z] of w_rz), f32 accumulate.
        rz = jnp.dot(x, w_rz_ref[...], preferred_element_type=jnp.float32)
        rz = jax.nn.sigmoid(rz + b_rz_ref[...])            # (Bp, 2Hp) f32
        r = rz[:, :Hp]
        z = rz[:, Hp:]

        # n gate: input side (emb|ctx rows) and hidden side kept separate so
        # that b_hh_n stays inside the r*(.) term (PyTorch GRU semantics).
        gi_n = jnp.dot(x[:, :Ep + Hp], w_in_ref[...],
                       preferred_element_type=jnp.float32)
        gh_n = jnp.dot(x[:, Ep + Hp:], w_hn_ref[...],
                       preferred_element_type=jnp.float32)
        n = jnp.tanh(gi_n + b_n_ref[0:1, :] + r * (gh_n + b_n_ref[1:2, :]))

        h_new = (1.0 - z) * n + z * hid_f32                # (Bp, Hp) f32

        # feat = [emb | ctx | h_new]  (matches the permuted w_fc row layout).
        feat_ref[:, :Ep + Hp] = x[:, :Ep + Hp]
        feat_ref[:, Ep + Hp:] = h_new.astype(jnp.bfloat16)

    out_ref[...] = (jnp.dot(feat_ref[...], w_fc_ref[...],
                            preferred_element_type=jnp.float32)
                    + b_fc_ref[...])


def prepare_params(params, *, tile_o=1024):
    """One-time weight prep: fuse/permute per-source weight blocks, zero-pad all
    feature dims to lane multiples, cast matmul operands to bf16."""
    emb_table = jnp.asarray(params["embedding"], jnp.float32)   # (O, E)
    w_ih = jnp.asarray(params["w_ih"], jnp.float32)             # (E+H, 3H), gates r|z|n
    w_hh = jnp.asarray(params["w_hh"], jnp.float32)             # (H, 3H)
    b_ih = jnp.asarray(params["b_ih"], jnp.float32)             # (1, 3H)
    b_hh = jnp.asarray(params["b_hh"], jnp.float32)             # (1, 3H)
    w_fc = jnp.asarray(params["w_fc"], jnp.float32)             # (E+2H, O)
    b_fc = jnp.asarray(params["b_fc"], jnp.float32)             # (1, O)

    O, E = emb_table.shape
    H = w_hh.shape[0]

    Ep = _round_up(E, 128)
    Hp = _round_up(H, 128)
    Op = _round_up(O, 128)
    tO = min(tile_o, Op)
    Op = _round_up(Op, tO)              # O tile must divide the padded vocab
    Kp = Ep + 2 * Hp

    def gate_w(g):
        """(Kp, Hp) gate weight laid out for x = [emb | ctx | hid]."""
        cols = slice(g * H, (g + 1) * H)
        return jnp.concatenate([
            _pad2(w_ih[:E, cols], Ep, Hp),      # emb rows
            _pad2(w_ih[E:, cols], Hp, Hp),      # ctx rows
            _pad2(w_hh[:, cols], Hp, Hp),       # hid rows
        ], axis=0)

    # r and z gates fused along the lane axis -> single (Kp, 2Hp) matmul.
    w_rz = jnp.concatenate([gate_w(0), gate_w(1)], axis=1).astype(jnp.bfloat16)

    # n gate: input side (emb|ctx) and hidden side kept separate (bias placement).
    w_in = jnp.concatenate([
        _pad2(w_ih[:E, 2 * H:], Ep, Hp),
        _pad2(w_ih[E:, 2 * H:], Hp, Hp),
    ], axis=0).astype(jnp.bfloat16)                              # (Ep+Hp, Hp)
    w_hn = _pad2(w_hh[:, 2 * H:], Hp, Hp, jnp.bfloat16)          # (Hp, Hp)

    # Biases in f32 (added to f32 accumulators).  r/z biases pre-folded.
    b_rz = jnp.concatenate([
        _pad2(b_ih[:, 0:H] + b_hh[:, 0:H], 1, Hp),
        _pad2(b_ih[:, H:2 * H] + b_hh[:, H:2 * H], 1, Hp),
    ], axis=1)                                                   # (1, 2Hp)
    b_n = jnp.concatenate([
        _pad2(b_ih[:, 2 * H:], 1, Hp),                           # b_ih_n
        _pad2(b_hh[:, 2 * H:], 1, Hp),                           # b_hh_n
    ], axis=0)                                                   # (2, Hp)

    # fc weights: rows permuted/padded to the feat layout [emb | ctx | h_new].
    w_fc_p = jnp.concatenate([
        _pad2(w_fc[:E], Ep, Op),                 # emb rows
        _pad2(w_fc[E + H:], Hp, Op),             # ctx rows
        _pad2(w_fc[E:E + H], Hp, Op),            # h_new rows
    ], axis=0).astype(jnp.bfloat16)                              # (Kp, Op)
    b_fc_p = _pad2(b_fc, 1, Op)                                  # (1, Op) f32

    return dict(emb_table=emb_table.astype(jnp.bfloat16),
                w_rz=w_rz, w_in=w_in, w_hn=w_hn, b_rz=b_rz, b_n=b_n,
                w_fc=w_fc_p, b_fc=b_fc_p,
                E=E, H=H, O=O, Ep=Ep, Hp=Hp, Op=Op, Kp=Kp, tO=tO)


def decoder_forward(input_ids, hidden, context, prepped):
    """input_ids: (B,) int32; hidden, context: (1, B, H); returns logits (B, O)."""
    E, H, O = prepped["E"], prepped["H"], prepped["O"]
    Ep, Hp, Op, Kp, tO = (prepped["Ep"], prepped["Hp"], prepped["Op"],
                          prepped["Kp"], prepped["tO"])

    B = input_ids.shape[0]
    Bp = _round_up(B, 16)      # native bf16 (16,128) sublane packing

    # Glue: embedding gather (bf16 table) + squeeze the leading size-1 axis.
    # TODO(synk): training-mode dropout (random mask) not reproduced; eval identity.
    embedded = prepped["emb_table"][input_ids]                   # (B, E) bf16
    hid = hidden[0]                                              # (B, H) f32
    ctx = context[0]                                             # (B, H) f32

    emb_p = _pad2(embedded, Bp, Ep, jnp.bfloat16)                # (Bp, Ep)
    ctx_p = _pad2(ctx, Bp, Hp, jnp.bfloat16)                     # (Bp, Hp)
    hid_bf = _pad2(hid, Bp, Hp, jnp.bfloat16)                    # (Bp, Hp)
    hid_f32 = _pad2(hid, Bp, Hp, jnp.float32)                    # (Bp, Hp)
    x_p = jnp.concatenate([emb_p, ctx_p, hid_bf], axis=1)        # (Bp, Kp) bf16

    n_tiles = Op // tO
    resident = lambda j: (0, 0)
    tiled = lambda j: (0, j)

    logits_p = pl.pallas_call(
        _decoder_kernel,
        out_shape=jax.ShapeDtypeStruct((Bp, Op), jnp.float32),
        grid=(n_tiles,),
        in_specs=[
            pl.BlockSpec((Bp, Kp), resident),          # x = [emb|ctx|hid]   (resident)
            pl.BlockSpec((Bp, Hp), resident),          # hidden f32          (resident)
            pl.BlockSpec((Kp, 2 * Hp), resident),      # fused r|z weights   (resident)
            pl.BlockSpec((Ep + Hp, Hp), resident),     # n-gate input side   (resident)
            pl.BlockSpec((Hp, Hp), resident),          # n-gate hidden side  (resident)
            pl.BlockSpec((1, 2 * Hp), resident),       # r|z biases          (resident)
            pl.BlockSpec((2, Hp), resident),           # n-gate biases       (resident)
            pl.BlockSpec((Kp, tO), tiled),             # fused w_fc   streamed per O-tile
            pl.BlockSpec((1, tO), tiled),              # b_fc         streamed per O-tile
        ],
        out_specs=pl.BlockSpec((Bp, tO), tiled),
        scratch_shapes=[pltpu.VMEM((Bp, Kp), jnp.bfloat16)],     # feat = [emb|ctx|h_new]
        # "arbitrary": the O axis is a serial loop on-core so the GRU result in
        # the feat scratch (written on tile 0) is visible to every later tile.
        compiler_params=pltpu.CompilerParams(
            dimension_semantics=("arbitrary",)),
    )(x_p, hid_f32,
      prepped["w_rz"], prepped["w_in"], prepped["w_hn"],
      prepped["b_rz"], prepped["b_n"],
      prepped["w_fc"], prepped["b_fc"])

    return logits_p[:B, :O]


def decoder_reference(input_ids, hidden, context, params):
    """Pure-JAX f32 reference mirroring the PyTorch forward (eval mode)."""
    emb = params["embedding"][input_ids]                 # (B, E)
    hid, ctx = hidden[0], context[0]
    H = hid.shape[-1]
    x = jnp.concatenate([emb, ctx], axis=1)
    gi = x @ params["w_ih"] + params["b_ih"]
    gh = hid @ params["w_hh"] + params["b_hh"]
    r = jax.nn.sigmoid(gi[:, :H] + gh[:, :H])
    z = jax.nn.sigmoid(gi[:, H:2 * H] + gh[:, H:2 * H])
    n = jnp.tanh(gi[:, 2 * H:] + r * gh[:, 2 * H:])
    h_new = (1.0 - z) * n + z * hid
    feat = jnp.concatenate([emb, h_new, ctx], axis=1)
    return feat @ params["w_fc"] + params["b_fc"]


def init_params(key, output_dim, embedding_dim, hidden_dim):
    ks = jax.random.split(key, 7)
    s = 1.0 / np.sqrt(hidden_dim)
    return {
        # nn.Embedding(output_dim, embedding_dim)
        "embedding": jax.random.normal(ks[0], (output_dim, embedding_dim), jnp.float32),
        # nn.GRU(input=E+H, hidden=H): weights stored transposed (in, 3H), gates r|z|n
        "w_ih": jax.random.uniform(ks[1], (embedding_dim + hidden_dim, 3 * hidden_dim),
                                   jnp.float32, -s, s),
        "w_hh": jax.random.uniform(ks[2], (hidden_dim, 3 * hidden_dim),
                                   jnp.float32, -s, s),
        "b_ih": jax.random.uniform(ks[3], (1, 3 * hidden_dim), jnp.float32, -s, s),
        "b_hh": jax.random.uniform(ks[4], (1, 3 * hidden_dim), jnp.float32, -s, s),
        # nn.Linear(E + 2H, output_dim), stored transposed (in, out)
        "w_fc": jax.random.uniform(ks[5], (embedding_dim + 2 * hidden_dim, output_dim),
                                   jnp.float32, -s, s),
        "b_fc": jax.random.uniform(ks[6], (1, output_dim), jnp.float32, -s, s),
    }


if __name__ == "__main__":
    EMB_DIM = 32
    HID_DIM = 32
    BATCH = 8

    key = jax.random.PRNGKey(0)
    k_par, k_tok, k_hid, k_ctx, k_par2, k_tok2 = jax.random.split(key, 6)

    hidden = jax.random.normal(k_hid, (1, BATCH, HID_DIM), jnp.float32)          # (1, B, H)
    context = jax.random.normal(k_ctx, (1, BATCH, HID_DIM), jnp.float32)         # (1, B, H)

    # --- Case 1: small vocab, single O tile ---------------------------------
    OUTPUT_DIM = 64
    params = init_params(k_par, OUTPUT_DIM, EMB_DIM, HID_DIM)
    input_ids = jax.random.randint(k_tok, (BATCH,), 0, OUTPUT_DIM, jnp.int32)    # (B,)

    prepped = prepare_params(params)          # one-time weight fuse / pad / bf16 cast
    logits = decoder_forward(input_ids, hidden, context, prepped)
    logits = jax.block_until_ready(logits)

    ref = decoder_reference(input_ids, hidden, context, params)
    # bf16 MXU operands vs. f32 reference -> loosened tolerance (logit scale ~1).
    np.testing.assert_allclose(np.asarray(logits), np.asarray(ref), rtol=5e-2, atol=5e-2)

    # --- Case 2: multi-tile vocab (exercises the GRU hoist + scratch reuse) --
    OUTPUT_DIM2 = 320
    params2 = init_params(k_par2, OUTPUT_DIM2, EMB_DIM, HID_DIM)
    input_ids2 = jax.random.randint(k_tok2, (BATCH,), 0, OUTPUT_DIM2, jnp.int32)

    prepped2 = prepare_params(params2, tile_o=128)     # 3 O tiles
    logits2 = decoder_forward(input_ids2, hidden, context, prepped2)
    logits2 = jax.block_until_ready(logits2)

    ref2 = decoder_reference(input_ids2, hidden, context, params2)
    np.testing.assert_allclose(np.asarray(logits2), np.asarray(ref2), rtol=5e-2, atol=5e-2)

    print("KERNEL_OK")
</pallas_src>

<mosaic_0001>
module attributes {stable_mosaic.version = 11 : i64} {
  func.func @_decoder_kernel(%arg0: i32, %arg1: memref<16x384xbf16, #tpu.memory_space<vmem>>, %arg2: memref<16x128xf32, #tpu.memory_space<vmem>>, %arg3: memref<384x256xbf16, #tpu.memory_space<vmem>>, %arg4: memref<256x128xbf16, #tpu.memory_space<vmem>>, %arg5: memref<128x128xbf16, #tpu.memory_space<vmem>>, %arg6: memref<1x256xf32, #tpu.memory_space<vmem>>, %arg7: memref<2x128xf32, #tpu.memory_space<vmem>>, %arg8: memref<384x128xbf16, #tpu.memory_space<vmem>>, %arg9: memref<1x128xf32, #tpu.memory_space<vmem>>, %arg10: memref<16x128xf32, #tpu.memory_space<vmem>>, %arg11: memref<16x384xbf16, #tpu.memory_space<vmem>>) attributes {dimension_semantics = [#tpu.dimension_semantics<arbitrary>], iteration_bounds = array<i64: 1>, scalar_prefetch = 0 : i64, scratch_operands = 1 : i64, tpu.core_type = #tpu.core_type<tc>, window_params = [{pipeline_mode = #tpu.pipeline_mode<synchronous>, transform_indices = @transform_0, window_bounds = array<i64: 16, 384>}, {pipeline_mode = #tpu.pipeline_mode<synchronous>, transform_indices = @transform_1, window_bounds = array<i64: 16, 128>}, {pipeline_mode = #tpu.pipeline_mode<synchronous>, transform_indices = @transform_2, window_bounds = array<i64: 384, 256>}, {pipeline_mode = #tpu.pipeline_mode<synchronous>, transform_indices = @transform_3, window_bounds = array<i64: 256, 128>}, {pipeline_mode = #tpu.pipeline_mode<synchronous>, transform_indices = @transform_4, window_bounds = array<i64: 128, 128>}, {pipeline_mode = #tpu.pipeline_mode<synchronous>, transform_indices = @transform_5, window_bounds = array<i64: 1, 256>}, {pipeline_mode = #tpu.pipeline_mode<synchronous>, transform_indices = @transform_6, window_bounds = array<i64: 2, 128>}, {transform_indices = @transform_7, window_bounds = array<i64: 384, 128>}, {transform_indices = @transform_8, window_bounds = array<i64: 1, 128>}, {transform_indices = @transform_9, window_bounds = array<i64: 16, 128>}]} {
    %c0_i32 = arith.constant 0 : i32
    %0 = arith.cmpi eq, %arg0, %c0_i32 : i32
    %1 = arith.extui %0 : i1 to i32
    %c0_i32_0 = arith.constant 0 : i32
    %2 = arith.cmpi ne, %1, %c0_i32_0 : i32
    scf.if %2 {
      %c0_8 = arith.constant 0 : index
      %c0_9 = arith.constant 0 : index
      %10 = vector.load %arg1[%c0_8, %c0_9] : memref<16x384xbf16, #tpu.memory_space<vmem>>, vector<16x384xbf16>
      %c0_10 = arith.constant 0 : index
      %c0_11 = arith.constant 0 : index
      %11 = vector.load %arg2[%c0_10, %c0_11] : memref<16x128xf32, #tpu.memory_space<vmem>>, vector<16x128xf32>
      %c0_12 = arith.constant 0 : index
      %c0_13 = arith.constant 0 : index
      %12 = vector.load %arg3[%c0_12, %c0_13] : memref<384x256xbf16, #tpu.memory_space<vmem>>, vector<384x256xbf16>
      %cst_14 = arith.constant dense<0.000000e+00> : vector<16x256xf32>
      %13 = tpu.matmul %10, %12, %cst_14 {dimension_numbers = #tpu.dot_dimension_numbers<[1], [0], [0], [1], [0, 0, 1, 1], [], []>} : vector<16x384xbf16>, vector<384x256xbf16>, vector<16x256xf32> -> vector<16x256xf32>
      %c0_15 = arith.constant 0 : index
      %c0_16 = arith.constant 0 : index
      %14 = vector.load %arg6[%c0_15, %c0_16] : memref<1x256xf32, #tpu.memory_space<vmem>>, vector<1x256xf32>
      %15 = vector.broadcast %14 : vector<1x256xf32> to vector<16x256xf32>
      %16 = arith.addf %13, %15 : vector<16x256xf32>
      %17 = arith.negf %16 : vector<16x256xf32>
      %18 = math.exp %17 : vector<16x256xf32>
      %cst_17 = arith.constant 1.000000e+00 : f32
      %19 = vector.broadcast %cst_17 : f32 to vector<16x256xf32>
      %20 = arith.addf %19, %18 : vector<16x256xf32>
      %21 = arith.divf %19, %20 : vector<16x256xf32>
      %22 = vector.extract_strided_slice %21 {offsets = [0, 0], sizes = [16, 128], strides = [1, 1]} : vector<16x256xf32> to vector<16x128xf32>
      %23 = vector.extract_strided_slice %21 {offsets = [0, 128], sizes = [16, 128], strides = [1, 1]} : vector<16x256xf32> to vector<16x128xf32>
      %24 = vector.extract_strided_slice %10 {offsets = [0, 0], sizes = [16, 256], strides = [1, 1]} : vector<16x384xbf16> to vector<16x256xbf16>
      %c0_18 = arith.constant 0 : index
      %c0_19 = arith.constant 0 : index
      %25 = vector.load %arg4[%c0_18, %c0_19] : memref<256x128xbf16, #tpu.memory_space<vmem>>, vector<256x128xbf16>
      %cst_20 = arith.constant dense<0.000000e+00> : vector<16x128xf32>
      %26 = tpu.matmul %24, %25, %cst_20 {dimension_numbers = #tpu.dot_dimension_numbers<[1], [0], [0], [1], [0, 0, 1, 1], [], []>} : vector<16x256xbf16>, vector<256x128xbf16>, vector<16x128xf32> -> vector<16x128xf32>
      %27 = vector.extract_strided_slice %10 {offsets = [0, 256], sizes = [16, 128], strides = [1, 1]} : vector<16x384xbf16> to vector<16x128xbf16>
      %c0_21 = arith.constant 0 : index
      %c0_22 = arith.constant 0 : index
      %28 = vector.load %arg5[%c0_21, %c0_22] : memref<128x128xbf16, #tpu.memory_space<vmem>>, vector<128x128xbf16>
      %cst_23 = arith.constant dense<0.000000e+00> : vector<16x128xf32>
      %29 = tpu.matmul %27, %28, %cst_23 {dimension_numbers = #tpu.dot_dimension_numbers<[1], [0], [0], [1], [0, 0, 1, 1], [], []>} : vector<16x128xbf16>, vector<128x128xbf16>, vector<16x128xf32> -> vector<16x128xf32>
      %c0_24 = arith.constant 0 : index
      %c0_25 = arith.constant 0 : index
      %30 = vector.load %arg7[%c0_24, %c0_25] : memref<2x128xf32, #tpu.memory_space<vmem>>, vector<1x128xf32>
      %31 = vector.broadcast %30 : vector<1x128xf32> to vector<16x128xf32>
      %32 = arith.addf %26, %31 : vector<16x128xf32>
      %c1 = arith.constant 1 : index
      %c0_26 = arith.constant 0 : index
      %33 = vector.load %arg7[%c1, %c0_26] : memref<2x128xf32, #tpu.memory_space<vmem>>, vector<1x128xf32>
      %34 = vector.broadcast %33 : vector<1x128xf32> to vector<16x128xf32>
      %35 = arith.addf %29, %34 : vector<16x128xf32>
      %36 = arith.mulf %22, %35 : vector<16x128xf32>
      %37 = arith.addf %32, %36 : vector<16x128xf32>
      %38 = math.tanh %37 : vector<16x128xf32>
      %cst_27 = arith.constant 1.000000e+00 : f32
      %39 = vector.broadcast %cst_27 : f32 to vector<16x128xf32>
      %40 = arith.subf %39, %23 : vector<16x128xf32>
      %41 = arith.mulf %40, %38 : vector<16x128xf32>
      %42 = arith.mulf %23, %11 : vector<16x128xf32>
      %43 = arith.addf %41, %42 : vector<16x128xf32>
      %44 = vector.extract_strided_slice %10 {offsets = [0, 0], sizes = [16, 256], strides = [1, 1]} : vector<16x384xbf16> to vector<16x256xbf16>
      %c0_28 = arith.constant 0 : index
      %c0_29 = arith.constant 0 : index
      %45 = vector.load %arg11[%c0_28, %c0_29] : memref<16x384xbf16, #tpu.memory_space<vmem>>, vector<16x256xbf16>
      tpu.vector_store %arg11[%c0_28, %c0_29], %44 {strides = array<i32>} : memref<16x384xbf16, #tpu.memory_space<vmem>>, vector<16x256xbf16>,
      %46 = arith.truncf %43 : vector<16x128xf32> to vector<16x128xbf16>
      %c0_30 = arith.constant 0 : index
      %c256 = arith.constant 256 : index
      %47 = vector.load %arg11[%c0_30, %c256] : memref<16x384xbf16, #tpu.memory_space<vmem>>, vector<16x128xbf16>
      tpu.vector_store %arg11[%c0_30, %c256], %46 {strides = array<i32>} : memref<16x384xbf16, #tpu.memory_space<vmem>>, vector<16x128xbf16>,
    } else {
    }
    %c0 = arith.constant 0 : index
    %c0_1 = arith.constant 0 : index
    %3 = vector.load %arg11[%c0, %c0_1] : memref<16x384xbf16, #tpu.memory_space<vmem>>, vector<16x384xbf16>
    %c0_2 = arith.constant 0 : index
    %c0_3 = arith.constant 0 : index
    %4 = vector.load %arg8[%c0_2, %c0_3] : memref<384x128xbf16, #tpu.memory_space<vmem>>, vector<384x128xbf16>
    %cst = arith.constant dense<0.000000e+00> : vector<16x128xf32>
    %5 = tpu.matmul %3, %4, %cst {dimension_numbers = #tpu.dot_dimension_numbers<[1], [0], [0], [1], [0, 0, 1, 1], [], []>} : vector<16x384xbf16>, vector<384x128xbf16>, vector<16x128xf32> -> vector<16x128xf32>
    %c0_4 = arith.constant 0 : index
    %c0_5 = arith.constant 0 : index
    %6 = vector.load %arg9[%c0_4, %c0_5] : memref<1x128xf32, #tpu.memory_space<vmem>>, vector<1x128xf32>
    %7 = vector.broadcast %6 : vector<1x128xf32> to vector<16x128xf32>
    %8 = arith.addf %5, %7 : vector<16x128xf32>
    %c0_6 = arith.constant 0 : index
    %c0_7 = arith.constant 0 : index
    %9 = vector.load %arg10[%c0_6, %c0_7] : memref<16x128xf32, #tpu.memory_space<vmem>>, vector<16x128xf32>
    tpu.vector_store %arg10[%c0_6, %c0_7], %8 {strides = array<i32>} : memref<16x128xf32, #tpu.memory_space<vmem>>, vector<16x128xf32>,
    return
  }
  func.func @transform_0(%arg0: i32) -> (i32, i32) {
    %c0_i32 = arith.constant 0 : i32
    %c0_i32_0 = arith.constant 0 : i32
    %c0_i32_1 = arith.constant 0 : i32
    return %c0_i32, %c0_i32_0 : i32, i32
  }
  func.func @transform_1(%arg0: i32) -> (i32, i32) {
    %c0_i32 = arith.constant 0 : i32
    %c0_i32_0 = arith.constant 0 : i32
    %c0_i32_1 = arith.constant 0 : i32
    return %c0_i32, %c0_i32_0 : i32, i32
  }
  func.func @transform_2(%arg0: i32) -> (i32, i32) {
    %c0_i32 = arith.constant 0 : i32
    %c0_i32_0 = arith.constant 0 : i32
    %c0_i32_1 = arith.constant 0 : i32
    return %c0_i32, %c0_i32_0 : i32, i32
  }
  func.func @transform_3(%arg0: i32) -> (i32, i32) {
    %c0_i32 = arith.constant 0 : i32
    %c0_i32_0 = arith.constant 0 : i32
    %c0_i32_1 = arith.constant 0 : i32
    return %c0_i32, %c0_i32_0 : i32, i32
  }
  func.func @transform_4(%arg0: i32) -> (i32, i32) {
    %c0_i32 = arith.constant 0 : i32
    %c0_i32_0 = arith.constant 0 : i32
    %c0_i32_1 = arith.constant 0 : i32
    return %c0_i32, %c0_i32_0 : i32, i32
  }
  func.func @transform_5(%arg0: i32) -> (i32, i32) {
    %c0_i32 = arith.constant 0 : i32
    %c0_i32_0 = arith.constant 0 : i32
    %c0_i32_1 = arith.constant 0 : i32
    return %c0_i32, %c0_i32_0 : i32, i32
  }
  func.func @transform_6(%arg0: i32) -> (i32, i32) {
    %c0_i32 = arith.constant 0 : i32
    %c0_i32_0 = arith.constant 0 : i32
    %c0_i32_1 = arith.constant 0 : i32
    return %c0_i32, %c0_i32_0 : i32, i32
  }
  func.func @transform_7(%arg0: i32) -> (i32, i32) {
    %c0_i32 = arith.constant 0 : i32
    %c0_i32_0 = arith.constant 0 : i32
    return %c0_i32, %arg0 : i32, i32
  }
  func.func @transform_8(%arg0: i32) -> (i32, i32) {
    %c0_i32 = arith.constant 0 : i32
    %c0_i32_0 = arith.constant 0 : i32
    return %c0_i32, %arg0 : i32, i32
  }
  func.func @transform_9(%arg0: i32) -> (i32, i32) {
    %c0_i32 = arith.constant 0 : i32
    %c0_i32_0 = arith.constant 0 : i32
    return %c0_i32, %arg0 : i32, i32
  }
}

</mosaic_0001>

<bundles_post_ra>
// kernel: tpu_custom_call.1
= control target key start
LH: loop header
LB: loop body
LE: loop exit
PB: predicated region body
PF: predicated region fallthrough
CT: control target
= control target key end

     0   :  { %14 = vsyncpa [#allocation4], 0  ;;  %s2071_s0 = inlined_call_operand.hbm [shape: bf16[16,384], index: 0, kind: input, shape index: {}]   ;;  %s2072_s1 = inlined_call_operand.hbm [shape: f32[16,128], index: 1, kind: input, shape index: {}]   ;;  %s2073_s2 = inlined_call_operand.hbm [shape: bf16[384,256], index: 2, kind: input, shape index: {}]   ;;  %s2074_s3 = inlined_call_operand.hbm [shape: bf16[256,128], index: 3, kind: input, shape index: {}]   ;;  %s2075_s4 = inlined_call_operand.hbm [shape: bf16[128,128], index: 4, kind: input, shape index: {}]   ;;  %s2076_s5 = inlined_call_operand.vmem [shape: f32[1,256], index: 5, kind: input, shape index: {}]   ;;  %s2077_s6 = inlined_call_operand.vmem [shape: f32[2,128], index: 6, kind: input, shape index: {}]   ;;  %s2078_s7 = inlined_call_operand.hbm [shape: bf16[384,128], index: 7, kind: input, shape index: {}]   ;;  %s2079_s8 = inlined_call_operand.vmem [shape: f32[1,128], index: 8, kind: input, shape index: {}]   ;;  %s2080_s9 = inlined_call_operand.hbm [shape: f32[16,128], index: 9, kind: output, shape index: {}]  }
   0x1   :  { %15 = vsyncpa [#allocation7], 0 }
   0x2   :  { %16 = vsyncpa [#allocation10], 0 }
   0x3   :  { %17 = vsyncpa [#allocation13], 0  ;;  %s36_s11 = sshll.u32 %s2072_s1, 4  ;;  %s37_s11 = int_to_ptr.hbm [resolvable:$true] %s36_s11 }
   0x4   :  { %18 = vsyncpa [#allocation5], 0  ;;  %s1875_s12 = smov [#allocation6]   ;;  %s62_s16 = sshll.u32 %s2074_s3, 4  ;;  %s63_s16 = int_to_ptr.hbm [resolvable:$true] %s62_s16 }
   0x5   :  { %s38_s13 = sshll.u32 %s1875_s12, 4  ;;  %s1876_s17 = smov 128   ;;  %s39_s13 = int_to_ptr.vmem [resolvable:$true] %s38_s13 }
   0x6   :  { %s1877_s18 = smov 8   ;;  %s1878_s19 = smov [#allocation9]  }
   0x7   :  { %44 = dma.hbm_to_vmem [thread:$0]  %s37_s11, 256, %s39_s13, [#allocation7], %s1876_s17, %s1876_s17, %s1877_s18  }
   0x8   :  { %s64_s20 = sshll.u32 %s1878_s19, 4  ;;  %s1879_s1 = smov 64   ;;  %s65_s20 = int_to_ptr.vmem [resolvable:$true] %s64_s20 }
   0x9   :  { %s1880_s21 = smov 4   ;;  %s23_s3 = sshll.u32 %s2071_s0, 4  ;;  %s24_s3 = int_to_ptr.hbm [resolvable:$true] %s23_s3 }
   0xa   :  { %70 = dma.hbm_to_vmem [thread:$0]  %s63_s16, 2048, %s65_s20, [#allocation10], %s1879_s1, %s1879_s1, %s1880_s21  }
   0xb   :  { %s1881_s24 = smov [#allocation3]   ;;  %s49_s28 = sshll.u32 %s2073_s2, 4  ;;  %s50_s28 = int_to_ptr.hbm [resolvable:$true] %s49_s28 }
   0xc   :  { %s25_s25 = sshll.u32 %s1881_s24, 4  ;;  %s1882_s29 = smov 192   ;;  %s26_s25 = int_to_ptr.vmem [resolvable:$true] %s25_s25 }
   0xd   :  { %s1883_s30 = smov 12   ;;  %s1884_s10 = smov [#allocation8]  }
   0xe   :  { %31 = dma.hbm_to_vmem [thread:$0]  %s24_s3, 384, %s26_s25, [#allocation4], %s1882_s29, %s1882_s29, %s1883_s30  }
   0xf   :  { %s51_s11 = sshll.u32 %s1884_s10, 4  ;;  %s75_s14 = sshll.u32 %s2075_s4, 4  ;;  %s52_s11 = int_to_ptr.vmem [resolvable:$true] %s51_s11  ;;  %s76_s14 = int_to_ptr.hbm [resolvable:$true] %s75_s14 }
  0x10   :  { %57 = dma.hbm_to_vmem [thread:$0]  %s50_s28, 6144, %s52_s11, [#allocation7], %s1876_s17, %s1876_s17, %s1877_s18  }
  0x11   :  { %s92_s2 = sshll.u32 %s2078_s7, 4  ;;  %s1885_s16 = smov [#allocation11]   ;;  %s93_s2 = int_to_ptr.hbm [resolvable:$true] %s92_s2 }
  0x12   :  { %s77_s19 = sshll.u32 %s1885_s16, 4  ;;  %s1886_s20 = smov [#allocation12]   ;;  %s78_s19 = int_to_ptr.vmem [resolvable:$true] %s77_s19 }
  0x13   :  { %83 = dma.hbm_to_vmem [thread:$0]  %s76_s14, 1024, %s78_s19, [#allocation10], %s1879_s1, %s1879_s1, %s1880_s21  }
  0x14   :  { %s94_s4 = sshll.u32 %s1886_s20, 4  ;;  %s95_s4 = int_to_ptr.vmem [resolvable:$true] %s94_s4 }
  0x15   :  { %100 = dma.hbm_to_vmem [thread:$0]  %s93_s2, 3072, %s95_s4, [#allocation13], %s1879_s1, %s1879_s1, %s1880_s21  }
  0x16   :  { %1865 = dma.done.wait [#allocation4], 384  }
  0x17   :  { %1866 = vsyncadd [#allocation4], 4294966912 }
  0x18   :  { %1867 = dma.done.wait [#allocation7], 6400  }
  0x19   :  { %1868 = vsyncadd [#allocation7], 4294960896 }
  0x1a   :  { %1869 = dma.done.wait [#allocation10], 3072  }
  0x1b   :  { %1870 = vsyncadd [#allocation10], 4294964224 }
  0x1c   :  { %1871 = dma.done.wait [#allocation13], 3072  }
  0x1d   :  { %1872 = vsyncadd [#allocation13], 4294964224  ;;  %v1217_v0 = vld [vmem:[#allocation8 + $0x70] sm:$0xf]  ;;  %v1577_v1 = vld [vmem:[#allocation8 + $0x74] sm:$0xf0] }
  0x1e   :  { %v1345_v2 = vld [vmem:[#allocation8 + $0x170] sm:$0xf]  ;;  %v1218_v3 = vor.u32 %v1577_v1, %v1217_v0  ;;  %v1609_v4 = vld [vmem:[#allocation8 + $0x174] sm:$0xf0]  ;;  %v1209_v9 = vld [vmem:[#allocation8 + $0x60] sm:$0xf] }
  0x1f   :  { %v1281_v5 = vld [vmem:[#allocation8 + $0xf0] sm:$0xf]  ;;  %v1593_v6 = vld [vmem:[#allocation8 + $0xf4] sm:$0xf0]  ;;  %v1346_v7 = vor.u32 %v1609_v4, %v1345_v2  ;;  %v1575_v10 = vld [vmem:[#allocation8 + $0x64] sm:$0xf0] }
  0x20   :  { %v1282_v8 = vor.u32 %v1593_v6, %v1281_v5  ;;  %v1337_v11 = vld [vmem:[#allocation8 + $0x160] sm:$0xf]  ;;  %447 = vmatpush.bf16.msra.mxu0 %v1218_v3  ;;  %v1210_v12 = vor.u32 %v1575_v10, %v1209_v9  ;;  %v1607_v13 = vld [vmem:[#allocation8 + $0x164] sm:$0xf0]  ;;  %v1201_v18 = vld [vmem:[#allocation8 + $0x50] sm:$0xf] }
  0x21   :  { %v1273_v14 = vld [vmem:[#allocation8 + $0xe0] sm:$0xf]  ;;  %v1591_v15 = vld [vmem:[#allocation8 + $0xe4] sm:$0xf0]  ;;  %475 = vmatpush.bf16.msra.mxu2 %v1346_v7  ;;  %v1338_v16 = vor.u32 %v1607_v13, %v1337_v11  ;;  %v1573_v19 = vld [vmem:[#allocation8 + $0x54] sm:$0xf0] }
  0x22   :  { %461 = vmatpush.bf16.msra.mxu1 %v1282_v8  ;;  %v1274_v17 = vor.u32 %v1591_v15, %v1273_v14  ;;  %v1329_v20 = vld [vmem:[#allocation8 + $0x150] sm:$0xf]  ;;  %v1605_v21 = vld [vmem:[#allocation8 + $0x154] sm:$0xf0]  ;;  %v1202_v24 = vor.u32 %v1573_v19, %v1201_v18  ;;  %v1193_v25 = vld [vmem:[#allocation8 + $0x40] sm:$0xf] }
  0x23   :  { %v1265_v22 = vld [vmem:[#allocation8 + $0xd0] sm:$0xf]  ;;  %v1589_v23 = vld [vmem:[#allocation8 + $0xd4] sm:$0xf0]  ;;  %v1571_v26 = vld [vmem:[#allocation8 + $0x44] sm:$0xf0]  ;;  %v1330_v27 = vor.u32 %v1605_v21, %v1329_v20 }
  0x24   :  { %448 = vmatpush.bf16.msra.mxu0 %v1210_v12  ;;  %v1266_v28 = vor.u32 %v1589_v23, %v1265_v22  ;;  %v1321_v29 = vld [vmem:[#allocation8 + $0x140] sm:$0xf]  ;;  %v1603_v30 = vld [vmem:[#allocation8 + $0x144] sm:$0xf0]  ;;  %v1576_v33 = vld [vmem:[#allocation8 + $0x74] sm:$0xf]  ;;  %v1194_v36 = vor.u32 %v1571_v26, %v1193_v25 }
  0x25   :  { %476 = vmatpush.bf16.msra.mxu2 %v1338_v16  ;;  %v1257_v31 = vld [vmem:[#allocation8 + $0xc0] sm:$0xf]  ;;  %v1587_v32 = vld [vmem:[#allocation8 + $0xc4] sm:$0xf0]  ;;  %v1219_v34 = vld [vmem:[#allocation8 + $0x78] sm:$0xf0]  ;;  %v1322_v39 = vor.u32 %v1603_v30, %v1321_v29 }
  0x26   :  { %462 = vmatpush.bf16.msra.mxu1 %v1274_v17  ;;  %v1222_v35 = vor.u32 %v1576_v33, %v1219_v34  ;;  %v1185_v37 = vld [vmem:[#allocation8 + $0x30] sm:$0xf]  ;;  %v1569_v38 = vld [vmem:[#allocation8 + $0x34] sm:$0xf0]  ;;  %v1258_v40 = vor.u32 %v1587_v32, %v1257_v31  ;;  %v1574_v42 = vld [vmem:[#allocation8 + $0x64] sm:$0xf] }
  0x27   :  { %v1313_v41 = vld [vmem:[#allocation8 + $0x130] sm:$0xf]  ;;  %v1211_v43 = vld [vmem:[#allocation8 + $0x68] sm:$0xf0]  ;;  %v1601_v44 = vld [vmem:[#allocation8 + $0x134] sm:$0xf0]  ;;  %v1186_v49 = vor.u32 %v1569_v38, %v1185_v37 }
  0x28   :  { %449 = vmatpush.bf16.msra.mxu0 %v1202_v24  ;;  %489 = vmatpush.bf16.msra.mxu3 %v1222_v35  ;;  %v1249_v45 = vld [vmem:[#allocation8 + $0xb0] sm:$0xf]  ;;  %v1585_v46 = vld [vmem:[#allocation8 + $0xb4] sm:$0xf0]  ;;  %v1214_v47 = vor.u32 %v1574_v42, %v1211_v43  ;;  %v1572_v48 = vld [vmem:[#allocation8 + $0x54] sm:$0xf]  ;;  %v1314_v51 = vor.u32 %v1601_v44, %v1313_v41 }
  0x29   :  { %477 = vmatpush.bf16.msra.mxu2 %v1330_v27  ;;  %v1203_v50 = vld [vmem:[#allocation8 + $0x58] sm:$0xf0]  ;;  %v1250_v52 = vor.u32 %v1585_v46, %v1249_v45  ;;  %v1177_v53 = vld [vmem:[#allocation8 + $0x20] sm:$0xf]  ;;  %v1567_v54 = vld [vmem:[#allocation8 + $0x24] sm:$0xf0] }
  0x2a   :  { %463 = vmatpush.bf16.msra.mxu1 %v1266_v28  ;;  %v1305_v55 = vld [vmem:[#allocation8 + $0x120] sm:$0xf]  ;;  %v1599_v56 = vld [vmem:[#allocation8 + $0x124] sm:$0xf0]  ;;  %v1206_v59 = vor.u32 %v1572_v48, %v1203_v50  ;;  %v1570_v60 = vld [vmem:[#allocation8 + $0x44] sm:$0xf]  ;;  %v1178_v62 = vor.u32 %v1567_v54, %v1177_v53 }
  0x2b   :  { %v1241_v57 = vld [vmem:[#allocation8 + $0xa0] sm:$0xf]  ;;  %v1583_v58 = vld [vmem:[#allocation8 + $0xa4] sm:$0xf0]  ;;  %v1195_v61 = vld [vmem:[#allocation8 + $0x48] sm:$0xf0]  ;;  %v1306_v63 = vor.u32 %v1599_v56, %v1305_v55 }
  0x2c   :  { %450 = vmatpush.bf16.msra.mxu0 %v1194_v36  ;;  %490 = vmatpush.bf16.msra.mxu3 %v1214_v47  ;;  %v1242_v0 = vor.u32 %v1583_v58, %v1241_v57  ;;  %v1169_v1 = vld [vmem:[#allocation8 + $0x10] sm:$0xf]  ;;  %v1565_v2 = vld [vmem:[#allocation8 + $0x14] sm:$0xf0]  ;;  %v1198_v7 = vor.u32 %v1570_v60, %v1195_v61  ;;  %v1568_v8 = vld [vmem:[#allocation8 + $0x34] sm:$0xf] }
  0x2d   :  { %478 = vmatpush.bf16.msra.mxu2 %v1322_v39  ;;  %v1297_v3 = vld [vmem:[#allocation8 + $0x110] sm:$0xf]  ;;  %v1597_v4 = vld [vmem:[#allocation8 + $0x114] sm:$0xf0]  ;;  %v1187_v9 = vld [vmem:[#allocation8 + $0x38] sm:$0xf0]  ;;  %v1170_v10 = vor.u32 %v1565_v2, %v1169_v1 }
  0x2e   :  { %464 = vmatpush.bf16.msra.mxu1 %v1258_v40  ;;  %v1233_v5 = vld [vmem:[#allocation8 + $0x90] sm:$0xf]  ;;  %v1581_v6 = vld [vmem:[#allocation8 + $0x94] sm:$0xf0]  ;;  %v1161_v11 = vld [vmem:[#allocation8] sm:$0xf]  ;;  %v1298_v13 = vor.u32 %v1597_v4, %v1297_v3  ;;  %v1190_v21 = vor.u32 %v1568_v8, %v1187_v9 }
  0x2f   :  { %v1563_v12 = vld [vmem:[#allocation8 + $0x4] sm:$0xf0]  ;;  %v1234_v14 = vor.u32 %v1581_v6, %v1233_v5  ;;  %v1289_v15 = vld [vmem:[#allocation8 + $0x100] sm:$0xf]  ;;  %v1592_v17 = vld [vmem:[#allocation8 + $0xf4] sm:$0xf] }
  0x30   :  { %451 = vmatpush.bf16.msra.mxu0 %v1186_v49  ;;  %491 = vmatpush.bf16.msra.mxu3 %v1206_v59  ;;  %v1595_v16 = vld [vmem:[#allocation8 + $0x104] sm:$0xf0]  ;;  %v1283_v18 = vld [vmem:[#allocation8 + $0xf8] sm:$0xf0]  ;;  %v1225_v19 = vld [vmem:[#allocation8 + $0x80] sm:$0xf]  ;;  %v1162_v25 = vor.u32 %v1563_v12, %v1161_v11 }
  0x31   :  { %479 = vmatpush.bf16.msra.mxu2 %v1314_v51  ;;  %v1579_v20 = vld [vmem:[#allocation8 + $0x84] sm:$0xf0]  ;;  %v1608_v22 = vld [vmem:[#allocation8 + $0x174] sm:$0xf]  ;;  %v1566_v23 = vld [vmem:[#allocation8 + $0x24] sm:$0xf]  ;;  %v1290_v29 = vor.u32 %v1595_v16, %v1289_v15  ;;  %v1286_v30 = vor.u32 %v1592_v17, %v1283_v18 }
  0x32   :  { %465 = vmatpush.bf16.msra.mxu1 %v1250_v52  ;;  %v1179_v24 = vld [vmem:[#allocation8 + $0x28] sm:$0xf0]  ;;  %v1347_v26 = vld [vmem:[#allocation8 + $0x178] sm:$0xf0]  ;;  %v1149_v27 = vld [vmem:[#allocation3] sm:$0xf]  ;;  %v1226_v34 = vor.u32 %v1579_v20, %v1225_v19 }
  0x33   :  { %v1560_v28 = vld [vmem:[#allocation3 + $0x8] sm:$0xf0]  ;;  %v1157_v31 = vld [vmem:[#allocation3 + $0x8] sm:$0xf]  ;;  %v1561_v32 = vld [vmem:[#allocation3 + $0x10] sm:$0xf0]  ;;  %v1182_v38 = vor.u32 %v1566_v23, %v1179_v24  ;;  %v1350_v39 = vor.u32 %v1608_v22, %v1347_v26 }
  0x34   :  { %452 = vmatpush.bf16.msra.mxu0 %v1178_v62  ;;  %492 = vmatpush.bf16.msra.mxu3 %v1198_v7  ;;  %v1590_v33 = vld [vmem:[#allocation8 + $0xe4] sm:$0xf]  ;;  %v1275_v35 = vld [vmem:[#allocation8 + $0xe8] sm:$0xf0]  ;;  %v1559_v36 = vld [vmem:[#allocation3 + $0x4] sm:$0xf]  ;;  %v1971_v40 = vor.u32 %v1560_v28, %v1149_v27  ;;  %v1973_v43 = vor.u32 %v1561_v32, %v1157_v31 }
  0x35   :  { %480 = vmatpush.bf16.msra.mxu2 %v1306_v63  ;;  %v1151_v37 = vld [vmem:[#allocation3 + $0xc] sm:$0xf0]  ;;  %v1564_v41 = vld [vmem:[#allocation8 + $0x14] sm:$0xf]  ;;  %v1171_v42 = vld [vmem:[#allocation8 + $0x18] sm:$0xf0]  ;;  %v1278_v46 = vor.u32 %v1590_v33, %v1275_v35 }
  0x36   :  { %466 = vmatpush.bf16.msra.mxu1 %v1242_v0  ;;  %v1606_v44 = vld [vmem:[#allocation8 + $0x164] sm:$0xf]  ;;  %v1339_v45 = vld [vmem:[#allocation8 + $0x168] sm:$0xf0]  ;;  %v1975_v47 = vor.u32 %v1559_v36, %v1151_v37  ;;  %v1588_v48 = vld [vmem:[#allocation8 + $0xd4] sm:$0xf]  ;;  %v1174_v50 = vor.u32 %v1564_v41, %v1171_v42 }
  0x37   :  { %v1267_v49 = vld [vmem:[#allocation8 + $0xd8] sm:$0xf0]  ;;  %v1342_v52 = vor.u32 %v1606_v44, %v1339_v45  ;;  %v1562_v53 = vld [vmem:[#allocation8 + $0x4] sm:$0xf]  ;;  %v1163_v54 = vld [vmem:[#allocation8 + $0x8] sm:$0xf0] }
  0x38   :  { %453 = vmatpush.bf16.msra.mxu0 %v1170_v10  ;;  %493 = vmatpush.bf16.msra.mxu3 %v1190_v21  ;;  %v1617_v51 = vld [vmem:[#allocation9 + $0x38] sm:$0xff]  ;;  %v1604_v55 = vld [vmem:[#allocation8 + $0x154] sm:$0xf]  ;;  %v1270_v57 = vor.u32 %v1588_v48, %v1267_v49  ;;  %v1586_v58 = vld [vmem:[#allocation8 + $0xc4] sm:$0xf]  ;;  %v1166_v60 = vor.u32 %v1562_v53, %v1163_v54  ;;  %s1887_s24 = smov [#allocation14]  }
  0x39   :  { %481 = vmatpush.bf16.msra.mxu2 %v1298_v13  ;;  %v1331_v56 = vld [vmem:[#allocation8 + $0x158] sm:$0xf0]  ;;  %v1259_v59 = vld [vmem:[#allocation8 + $0xc8] sm:$0xf0]  ;;  %v1616_v61 = vld [vmem:[#allocation9 + $0x30] sm:$0xff]  ;;  %s1129_s25 = sshll.u32 %s1887_s24, 4  ;;  %s1130_s25 = int_to_ptr.vmem [resolvable:$true] %s1129_s25 }
  0x3a   :  { %467 = vmatpush.bf16.msra.mxu1 %v1234_v14  ;;  %v1334_v62 = vor.u32 %v1604_v55, %v1331_v56  ;;  %v1625_v63 = vld [vmem:[#allocation9 + $0x78] sm:$0xff]  ;;  %v1602_v0 = vld [vmem:[#allocation8 + $0x144] sm:$0xf]  ;;  %v1323_v1 = vld [vmem:[#allocation8 + $0x148] sm:$0xf0]  ;;  %v1262_v2 = vor.u32 %v1586_v58, %v1259_v59  ;;  %s1131_s28 = sshll.u32 %s2080_s9, 4  ;;  %s1132_s28 = int_to_ptr.hbm [resolvable:$true] %s1131_s28 }
  0x3b   :  { %v1584_v3 = vld [vmem:[#allocation8 + $0xb4] sm:$0xf]  ;;  %v1251_v4 = vld [vmem:[#allocation8 + $0xb8] sm:$0xf0]  ;;  %v1615_v5 = vld [vmem:[#allocation9 + $0x28] sm:$0xff]  ;;  %v1326_v6 = vor.u32 %v1602_v0, %v1323_v1 }
  0x3c   :  { %454 = vmatpush.bf16.msra.mxu0 %v1162_v25  ;;  %494 = vmatpush.bf16.msra.mxu3 %v1182_v38  ;;  %v1624_v7 = vld [vmem:[#allocation9 + $0x70] sm:$0xff]  ;;  %v1315_v9 = vld [vmem:[#allocation8 + $0x138] sm:$0xf0]  ;;  %v1254_v10 = vor.u32 %v1584_v3, %v1251_v4  ;;  %v1582_v11 = vld [vmem:[#allocation8 + $0xa4] sm:$0xf] }
  0x3d   :  { %482 = vmatpush.bf16.msra.mxu2 %v1290_v29  ;;  %v1600_v8 = vld [vmem:[#allocation8 + $0x134] sm:$0xf]  ;;  %v1243_v12 = vld [vmem:[#allocation8 + $0xa8] sm:$0xf0]  ;;  %v1614_v13 = vld [vmem:[#allocation9 + $0x20] sm:$0xff] }
  0x3e   :  { %468 = vmatpush.bf16.msra.mxu1 %v1226_v34  ;;  %v1318_v14 = vor.u32 %v1600_v8, %v1315_v9  ;;  %v1623_v15 = vld [vmem:[#allocation9 + $0x68] sm:$0xff]  ;;  %v1598_v16 = vld [vmem:[#allocation8 + $0x124] sm:$0xf]  ;;  %v1246_v18 = vor.u32 %v1582_v11, %v1243_v12  ;;  %v1580_v19 = vld [vmem:[#allocation8 + $0x94] sm:$0xf] }
  0x3f   :  { %455 = vmatmul.bf16.vlgmr.msra.gmra.mxu0 %v1971_v40  ;;  %v1307_v17 = vld [vmem:[#allocation8 + $0x128] sm:$0xf0]  ;;  %v1235_v20 = vld [vmem:[#allocation8 + $0x98] sm:$0xf0]  ;;  %v1622_v23 = vld [vmem:[#allocation9 + $0x60] sm:$0xff] }
  0x40   :  { %503 = vmatpush.bf16.msrb.mxu0 %v1286_v30  ;;  %483 = vmatmul.bf16.vlgmr.msra.gmra.mxu2 %v1973_v43  ;;  %v1613_v21 = vld [vmem:[#allocation9 + $0x18] sm:$0xff]  ;;  %v1310_v22 = vor.u32 %v1598_v16, %v1307_v17  ;;  %v1596_v24 = vld [vmem:[#allocation8 + $0x114] sm:$0xf]  ;;  %v1238_v26 = vor.u32 %v1580_v19, %v1235_v20  ;;  %v1578_v27 = vld [vmem:[#allocation8 + $0x84] sm:$0xf] }
  0x41   :  { %469 = vmatmul.bf16.vlgmr.msra.gmra.mxu1 %v1975_v47  ;;  %495 = vmatpush.bf16.msra.mxu3 %v1174_v50  ;;  %v1299_v25 = vld [vmem:[#allocation8 + $0x118] sm:$0xf0]  ;;  %v1227_v28 = vld [vmem:[#allocation8 + $0x88] sm:$0xf0]  ;;  %v1612_v29 = vld [vmem:[#allocation9 + $0x10] sm:$0xff] }
  0x42   :  { %517 = vmatpush.bf16.msrb.mxu1 %v1350_v39  ;;  %753 = vmatpush.bf16.msrb.mxu2 %v1617_v51  ;;  %v1302_v30 = vor.u32 %v1596_v24, %v1299_v25  ;;  %v1621_v31 = vld [vmem:[#allocation9 + $0x58] sm:$0xff]  ;;  %v1594_v32 = vld [vmem:[#allocation8 + $0x104] sm:$0xf]  ;;  %v1291_v33 = vld [vmem:[#allocation8 + $0x108] sm:$0xf0]  ;;  %v1230_v34 = vor.u32 %v1578_v27, %v1227_v28 }
  0x43   :  { %v1633_v35 = vld [vmem:[#allocation11 + $0x38] sm:$0xff]  ;;  %v1611_v36 = vld [vmem:[#allocation9 + $0x8] sm:$0xff]  ;;  %v1294_v37 = vor.u32 %v1594_v32, %v1291_v33  ;;  %v1620_v38 = vld [vmem:[#allocation9 + $0x50] sm:$0xff] }
  0x44   :  { %504 = vmatpush.bf16.msrb.mxu0 %v1278_v46  ;;  %v1632_v39 = vld [vmem:[#allocation11 + $0x30] sm:$0xff]  ;;  %v1619_v41 = vld [vmem:[#allocation9 + $0x48] sm:$0xff]  ;;  %v1610_v42 = vld [vmem:[#allocation9] sm:$0xff] }
  0x45   :  { %496 = vmatpush.bf16.msra.mxu3 %v1166_v60  ;;  %v1631_v44 = vld [vmem:[#allocation11 + $0x28] sm:$0xff]  ;;  %v1618_v45 = vld [vmem:[#allocation9 + $0x40] sm:$0xff]  ;;  %v1629_v48 = vld [vmem:[#allocation11 + $0x18] sm:$0xff] }
  0x46   :  { %518 = vmatpush.bf16.msrb.mxu1 %v1342_v52  ;;  %754 = vmatpush.bf16.msrb.mxu2 %v1616_v61  ;;  %v1630_v46 = vld [vmem:[#allocation11 + $0x20] sm:$0xff]  ;;  %v1628_v49 = vld [vmem:[#allocation11 + $0x10] sm:$0xff]  ;;  %v1627_v50 = vld [vmem:[#allocation11 + $0x8] sm:$0xff] }
  0x47   :  { %v1626_v51 = vld [vmem:[#allocation11] sm:$0xff]  ;;  %v1651_v8 = vld [vmem:[#allocation12 + $0x70] sm:$0xff]  ;;  %v1650_v12 = vld [vmem:[#allocation12 + $0x68] sm:$0xff] }
  0x48   :  { %505 = vmatpush.bf16.msrb.mxu0 %v1270_v57  ;;  %497 = vmatmul.bf16.vlgmr.msra.gmra.mxu3 %v1971_v40  ;;  %v185_v52 = vld [vmem:[%s2076_s5] sm:$0x3]  ;;  %v1643_v11 = vld [vmem:[#allocation12 + $0x30] sm:$0xff]  ;;  %v1660_v16 = vld [vmem:[#allocation12 + $0xb8] sm:$0xff] }
  0x49   :  { %767 = vmatpush.bf16.msrb.mxu3 %v1625_v63  ;;  %v187_v53 = vperm.slane %v185_v52, 0  ;;  %v188_v1 = vperm.slane %v185_v52, 1  ;;  %v1642_v20 = vld [vmem:[#allocation12 + $0x28] sm:$0xff]  ;;  %v1659_v25 = vld [vmem:[#allocation12 + $0xb0] sm:$0xff]  ;;  %v1641_v28 = vld [vmem:[#allocation12 + $0x20] sm:$0xff] }
  0x4a   :  { %519 = vmatpush.bf16.msrb.mxu1 %v1334_v62  ;;  %755 = vmatpush.bf16.msrb.mxu2 %v1615_v5  ;;  %v1658_v32 = vld [vmem:[#allocation12 + $0xa8] sm:$0xff] }
  0x4c   :  { %506 = vmatpush.bf16.msrb.mxu0 %v1262_v2  ;;  %v1652_v2 = vld [vmem:[#allocation12 + $0x78] sm:$0xff] }
  0x4d   :  { %768 = vmatpush.bf16.msrb.mxu3 %v1624_v7 }
  0x4e   :  { %520 = vmatpush.bf16.msrb.mxu1 %v1326_v6  ;;  %756 = vmatpush.bf16.msrb.mxu2 %v1614_v13  ;;  %v1644_v6 = vld [vmem:[#allocation12 + $0x38] sm:$0xff] }
  0x50   :  { %507 = vmatpush.bf16.msrb.mxu0 %v1254_v10 }
  0x51   :  { %769 = vmatpush.bf16.msrb.mxu3 %v1623_v15 }
  0x52   :  { %521 = vmatpush.bf16.msrb.mxu1 %v1318_v14  ;;  %757 = vmatpush.bf16.msrb.mxu2 %v1613_v21  ;;  %v1649_v21 = vld [vmem:[#allocation12 + $0x60] sm:$0xff] }
  0x54   :  { %508 = vmatpush.bf16.msrb.mxu0 %v1246_v18 }
  0x55   :  { %770 = vmatpush.bf16.msrb.mxu3 %v1622_v23 }
  0x56   :  { %522 = vmatpush.bf16.msrb.mxu1 %v1310_v22  ;;  %758 = vmatpush.bf16.msrb.mxu2 %v1612_v29  ;;  %v1648_v29 = vld [vmem:[#allocation12 + $0x58] sm:$0xff] }
  0x58   :  { %509 = vmatpush.bf16.msrb.mxu0 %v1238_v26 }
  0x59   :  { %771 = vmatpush.bf16.msrb.mxu3 %v1621_v31 }
  0x5a   :  { %523 = vmatpush.bf16.msrb.mxu1 %v1302_v30  ;;  %759 = vmatpush.bf16.msrb.mxu2 %v1611_v36  ;;  %v1640_v36 = vld [vmem:[#allocation12 + $0x18] sm:$0xff] }
  0x5c   :  { %510 = vmatpush.bf16.msrb.mxu0 %v1230_v34 }
  0x5d   :  { %772 = vmatpush.bf16.msrb.mxu3 %v1620_v38 }
  0x5e   :  { %524 = vmatpush.bf16.msrb.mxu1 %v1294_v37  ;;  %760 = vmatpush.bf16.msrb.mxu2 %v1610_v42  ;;  %v1647_v37 = vld [vmem:[#allocation12 + $0x50] sm:$0xff]  ;;  %v133_v42 = vld [vmem:[#allocation3 + $0xc] sm:$0xff] }
  0x5f   :  { %511 = vmatmul.bf16.vlgmr.msrb.gmra.mxu0 %v1975_v47  ;;  %860 = vst [vmem:[#allocation2 + $0xc] sm:$0xff] %v133_v42 }
  0x60   :  { %831 = vmatpush.bf16.msra.mxu0 %v1633_v35 }
  0x61   :  { %525 = vmatmul.bf16.vlgmr.msrb.gmra.mxu1 %v1973_v43  ;;  %773 = vmatpush.bf16.msrb.mxu3 %v1619_v41  ;;  %v131_v41 = vld [vmem:[#allocation3] sm:$0xff] }
  0x62   :  { %761 = vmatmul.bf16.vlgmr.msrb.gmra.mxu2 %v1971_v40  ;;  %1081 = vmatpush.bf16.msra.mxu1 %v1644_v6  ;;  %859 = vst [vmem:[#allocation2] sm:$0xff] %v131_v41  ;;  %v1654_v6 = vld [vmem:[#allocation12 + $0x88] sm:$0xff] }
  0x63   :  { %1095 = vmatpush.bf16.msra.mxu2 %v1652_v2  ;;  %v1637_v2 = vld [vmem:[#allocation12] sm:$0xff] }
  0x64   :  { %832 = vmatpush.bf16.msra.mxu0 %v1632_v39  ;;  %v1657_v39 = vld [vmem:[#allocation12 + $0xa0] sm:$0xff] }
  0x65   :  { %774 = vmatpush.bf16.msrb.mxu3 %v1618_v45  ;;  %v1639_v45 = vld [vmem:[#allocation12 + $0x10] sm:$0xff] }
  0x66   :  { %1082 = vmatpush.bf16.msra.mxu1 %v1643_v11 }
  0x67   :  { %1096 = vmatpush.bf16.msra.mxu2 %v1651_v8  ;;  %v1635_v8 = vld [vmem:[#allocation2 + $0x8] sm:$0xf0] }
  0x68   :  { %833 = vmatpush.bf16.msra.mxu0 %v1631_v44  ;;  %775 = vmatmul.bf16.vlgmr.msrb.gmra.mxu3 %v1975_v47 }
  0x69   :  { %1109 = vmatpush.bf16.msra.mxu3 %v1660_v16 }
  0x6a   :  { %1083 = vmatpush.bf16.msra.mxu1 %v1642_v20  ;;  %v1653_v20 = vld [vmem:[#allocation12 + $0x80] sm:$0xff] }
  0x6b   :  { %1097 = vmatpush.bf16.msra.mxu2 %v1650_v12 }
  0x6c   :  { %834 = vmatpush.bf16.msra.mxu0 %v1630_v46  ;;  %v1646_v46 = vld [vmem:[#allocation12 + $0x48] sm:$0xff] }
  0x6d   :  { %1110 = vmatpush.bf16.msra.mxu3 %v1659_v25 }
  0x6e   :  { %1084 = vmatpush.bf16.msra.mxu1 %v1641_v28 }
  0x6f   :  { %1098 = vmatpush.bf16.msra.mxu2 %v1649_v21 }
  0x70   :  { %835 = vmatpush.bf16.msra.mxu0 %v1629_v48 }
  0x71   :  { %1111 = vmatpush.bf16.msra.mxu3 %v1658_v32 }
  0x72   :  { %1085 = vmatpush.bf16.msra.mxu1 %v1640_v36 }
  0x73   :  { %1099 = vmatpush.bf16.msra.mxu2 %v1648_v29 }
  0x74   :  { %836 = vmatpush.bf16.msra.mxu0 %v1628_v49 }
  0x75   :  { %1112 = vmatpush.bf16.msra.mxu3 %v1657_v39 }
  0x76   :  { %1086 = vmatpush.bf16.msra.mxu1 %v1639_v45 }
  0x77   :  { %1100 = vmatpush.bf16.msra.mxu2 %v1647_v37 }
  0x78   :  { %837 = vmatpush.bf16.msra.mxu0 %v1627_v50  ;;  %v1656_v50 = vld [vmem:[#allocation12 + $0x98] sm:$0xff] }
  0x79   :  { %1113 = vmatpush.bf16.msra.mxu3 %v1656_v50 }
  0x7b   :  { %1101 = vmatpush.bf16.msra.mxu2 %v1646_v46 }
  0x7c   :  { %838 = vmatpush.bf16.msra.mxu0 %v1626_v51 }
  0x7f   :  { %839 = vmatmul.bf16.vlgmr.msra.gmra.mxu0 %v1973_v43 }
  0xbc   :  { %v456_v40 = vpop.f32.mrf.mxu0 }
  0xbd   :  { %v457_v54 = vadd.f32 %v456_v40, %v187_v53  ;;  %v2016_v40 = vld [vmem:[%s2077_s6] ss:$0 sm:$0xff] }
  0xbe   :  { %v470_v55 = vpop.f32.mrf.mxu1 }
  0xbf   :  { %v471_v56 = vadd.f32 %v470_v55, %v457_v54  ;;  %v1638_v55 = vld [vmem:[#allocation12 + $0x8] sm:$0xff] }
  0xc0   :  { %1087 = vmatpush.bf16.msra.mxu1 %v1638_v55 }
  0xc3   :  { %v484_v57 = vpop.f32.mrf.mxu2 }
  0xc4   :  { %v458_v47 = vpop.f32.mrf.mxu0  ;;  %v485_v58 = vadd.f32 %v484_v57, %v471_v56  ;;  %v1645_v56 = vld [vmem:[#allocation12 + $0x40] sm:$0xff]  ;;  %1088 = vmatpush.bf16.msra.mxu1 %v1637_v2 }
  0xc5   :  { %v459_v59 = vadd.f32 %v458_v47, %v187_v53  ;;  %1102 = vmatpush.bf16.msra.mxu2 %v1645_v56 }
  0xc6   :  { %v472_v60 = vpop.f32.mrf.mxu1  ;;  %v1351_v61 = vmul.f32 -1.442695, %v485_v58 }
  0xc7   :  { %v473_v62 = vadd.f32 %v472_v60, %v459_v59 }
  0xc8   :  { %1677 = vpow2.f32 %v1351_v61 }
  0xcb   :  { %v486_v63 = vpop.f32.mrf.mxu2  ;;  %v498_v43 = vpop.f32.mrf.mxu3 }
  0xcc   :  { %v487_v0 = vadd.f32 %v486_v63, %v473_v62  ;;  %v499_v5 = vadd.f32 %v498_v43, %v188_v1  ;;  %v1655_v62 = vld [vmem:[#allocation12 + $0x90] sm:$0xff]  ;;  %v1634_v63 = vld [vmem:[#allocation2 + $0x4] sm:$0xf]  ;;  %v1675_v43 = vld [vmem:[%s2077_s6 + $0x1] ss:$0 sm:$0xff] }
  0xcd   :  { %1114 = vmatpush.bf16.msra.mxu3 %v1655_v62 }
  0xce   :  { %v1353_v3 = vmul.f32 -1.442695, %v487_v0  ;;  %v1678_v4 = vpop.eup %1677 }
  0xcf   :  { %v1989_v7 = vadd.f32 1.0, %v1678_v4 }
  0xd0   :  { %1679 = vpow2.f32 %v1353_v3 }
  0xd1   :  { %1681 = vrcp.f32 %v1989_v7  ;;  %vm552_vm0 = vweird.f32 %v1989_v7  ;;  %v558_v54 = vand.u32 2147483648, %v1989_v7  ;;  %v556_v59 = vand.u32 2147483647, %v1989_v7  ;;  %1115 = vmatpush.bf16.msra.mxu3 %v1654_v6 }
  0xd3   :  { %v500_v14 = vpop.f32.mrf.mxu3  ;;  %v559_v4 = vor.u32 1.1754944e-38, %v558_v54  ;;  %vm557_vm3 = vcmp.eq.f32.partialorder %v556_v59, 8.507059e+37 }
  0xd4   :  { %v501_v19 = vadd.f32 %v500_v14, %v188_v1  ;;  %v1455_v1 = vld [vmem:[#allocation2 + $0xc] sm:$0xf0] }
  0xd5   :  { %1116 = vmatpush.bf16.msra.mxu3 %v1653_v20 }
  0xd6   :  { %v1680_v17 = vpop.eup %1679 }
  0xd7   :  { %v1992_v22 = vadd.f32 1.0, %v1680_v17  ;;  %v1994_v23 = vpop.eup %1681 }
  0xd8   :  { %v548_v31 = vmul.f32 %v1994_v23, %v1989_v7  ;;  %vm553_vm1 = vweird.f32 %v1994_v23  ;;  %v1453_v7 = vld [vmem:[#allocation2] sm:$0xf] }
  0xd9   :  { %vm2024_vm2 = vmor %vm552_vm0, %vm553_vm1  ;;  %v1454_v12 = vor.u32 %v1635_v8, %v1453_v7  ;;  %vm582_vm4 = vweird.f32 %v1992_v22  ;;  %v586_v32 = vand.u32 2147483647, %v1992_v22 }
  0xda   :  { %v549_v38 = vsub.f32 1.0, %v548_v31 }
  0xdb   :  { %1089 = vmatmul.bf16.vlgmr.msra.gmra.mxu1 %v1454_v12  ;;  %vm587_vm11 = vcmp.eq.f32.partialorder %v586_v32, 8.507059e+37 }
  0xdc   :  { %v512_v9 = vpop.f32.mrf.mxu0  ;;  %v550_v48 = vmul.f32 %v1994_v23, %v549_v38 }
  0xdd   :  { %v513_v10 = vadd.f32 %v512_v9, %v499_v5  ;;  %v1458_v5 = vor.u32 %v1634_v63, %v1455_v1 }
  0xde   :  { %v526_v13 = vpop.f32.mrf.mxu1  ;;  %v551_v58 = vadd.f32 %v1994_v23, %v550_v48 }
  0xdf   :  { %v527_v15 = vadd.f32 %v526_v13, %v513_v10  ;;  %1103 = vmatmul.bf16.vlgmr.msra.gmra.mxu2 %v1458_v5  ;;  %v1676_v5 = vld [vmem:[%s2079_s8] ss:$0 sm:$0xff] }
  0xe0   :  { %v555_v11 = vsel %vm2024_vm2, %v1994_v23, %v551_v58 }
  0xe1   :  { %v1352_v18 = vmul.f32 -1.442695, %v527_v15  ;;  %v560_v17 = vsel %vm557_vm3, %v559_v4, %v555_v11 }
  0xe3   :  { %1683 = vpow2.f32 %v1352_v18 }
  0xe4   :  { %v514_v24 = vpop.f32.mrf.mxu0  ;;  %1685 = vrcp.f32 %v1992_v22 }
  0xe5   :  { %v515_v26 = vadd.f32 %v514_v24, %v501_v19  ;;  %v762_v47 = vpop.f32.mrf.mxu2  ;;  %v588_v19 = vand.u32 2147483648, %v1992_v22 }
  0xe6   :  { %v528_v27 = vpop.f32.mrf.mxu1  ;;  %v763_v3 = vadd.f32 %v2016_v40, %v762_v47 }
  0xe7   :  { %v529_v30 = vadd.f32 %v528_v27, %v515_v26  ;;  %v589_v36 = vor.u32 1.1754944e-38, %v588_v19 }
  0xe9   :  { %v1684_v33 = vpop.eup %1683  ;;  %v1354_v34 = vmul.f32 -1.442695, %v529_v30 }
  0xea   :  { %v1999_v35 = vadd.f32 1.0, %v1684_v33  ;;  %v2002_v44 = vpop.eup %1685 }
  0xeb   :  { %1687 = vpow2.f32 %v1354_v34  ;;  %v578_v49 = vmul.f32 %v2002_v44, %v1992_v22  ;;  %v776_v10 = vpop.f32.mrf.mxu3  ;;  %vm583_vm7 = vweird.f32 %v2002_v44  ;;  %v135_v22 = vld [vmem:[#allocation6] sm:$0xff] }
  0xec   :  { %1689 = vrcp.f32 %v1999_v35  ;;  %v777_v16 = vadd.f32 %v776_v10, %v763_v3  ;;  %vm567_vm5 = vweird.f32 %v1999_v35  ;;  %v573_v24 = vand.u32 2147483648, %v1999_v35  ;;  %vm584_vm9 = vmor %vm582_vm4, %vm583_vm7 }
  0xed   :  { %v579_v61 = vsub.f32 1.0, %v578_v49  ;;  %v571_v27 = vand.u32 2147483647, %v1999_v35  ;;  %v764_v29 = vpop.f32.mrf.mxu2 }
  0xee   :  { %v765_v37 = vadd.f32 %v2016_v40, %v764_v29 }
  0xef   :  { %v580_v13 = vmul.f32 %v2002_v44, %v579_v61  ;;  %vm572_vm10 = vcmp.eq.f32.partialorder %v571_v27, 8.507059e+37  ;;  %v136_v61 = vld [vmem:[#allocation6 + $0x8] sm:$0xff] }
  0xf1   :  { %v1688_v51 = vpop.eup %1687  ;;  %v581_v26 = vadd.f32 %v2002_v44, %v580_v13 }
  0xf2   :  { %v2009_v52 = vpop.eup %1689  ;;  %v2011_v53 = vadd.f32 1.0, %v1688_v51 }
  0xf3   :  { %v563_v57 = vmul.f32 %v2009_v52, %v1999_v35  ;;  %vm568_vm6 = vweird.f32 %v2009_v52  ;;  %v574_v35 = vor.u32 1.1754944e-38, %v573_v24  ;;  %v585_v38 = vsel %vm584_vm9, %v2002_v44, %v581_v26  ;;  %v778_v39 = vpop.f32.mrf.mxu3 }
  0xf4   :  { %1691 = vrcp.f32 %v2011_v53  ;;  %vm2047_vm8 = vmor %vm567_vm5, %vm568_vm6  ;;  %v590_v48 = vsel %vm587_vm11, %v589_v36, %v585_v38  ;;  %v603_v49 = vand.u32 2147483648, %v2011_v53  ;;  %v779_v50 = vadd.f32 %v778_v39, %v765_v37 }
  0xf5   :  { %v564_v0 = vsub.f32 1.0, %v563_v57  ;;  %vm597_vm13 = vweird.f32 %v2011_v53 }
  0xf6   :  { %v604_v47 = vor.u32 1.1754944e-38, %v603_v49 }
  0xf7   :  { %v565_v9 = vmul.f32 %v2009_v52, %v564_v0 }
  0xf9   :  { %v566_v21 = vadd.f32 %v2009_v52, %v565_v9 }
  0xfa   :  { %v1692_v15 = vpop.eup %1691 }
  0xfb   :  { %v593_v23 = vmul.f32 %v1692_v15, %v2011_v53  ;;  %v570_v34 = vsel %vm2047_vm8, %v2009_v52, %v566_v21  ;;  %vm598_vm12 = vweird.f32 %v1692_v15  ;;  %v601_v52 = vand.u32 2147483647, %v2011_v53 }
  0xfc   :  { %v840_v14 = vpop.f32.mrf.mxu0  ;;  %v575_v42 = vsel %vm572_vm10, %v574_v35, %v570_v34  ;;  %vm599_vm14 = vmor %vm597_vm13, %vm598_vm12 }
  0xfd   :  { %v841_v18 = vadd.f32 %v1675_v43, %v840_v14  ;;  %v594_v28 = vsub.f32 1.0, %v593_v23  ;;  %v851_v40 = vsub.f32 1.0, %v575_v42  ;;  %v855_v56 = vmul.f32 %v575_v42, %v135_v22 }
  0xfe   :  { %vm602_vm15 = vcmp.eq.f32.partialorder %v601_v52, 8.507059e+37 }
  0xff   :  { %v845_v25 = vmul.f32 %v841_v18, %v560_v17  ;;  %v595_v33 = vmul.f32 %v1692_v15, %v594_v28 }
 0x101   :  { %v847_v31 = vadd.f32 %v845_v25, %v777_v16  ;;  %v596_v46 = vadd.f32 %v1692_v15, %v595_v33 }
 0x103   :  { %1693 = vtanh.f32 %v847_v31  ;;  %v600_v57 = vsel %vm599_vm14, %v1692_v15, %v596_v46 }
 0x104   :  { %v842_v41 = vpop.f32.mrf.mxu0  ;;  %v605_v59 = vsel %vm602_vm15, %v604_v47, %v600_v57 }
 0x105   :  { %v843_v45 = vadd.f32 %v1675_v43, %v842_v41  ;;  %v852_v62 = vsub.f32 1.0, %v605_v59  ;;  %v856_v43 = vmul.f32 %v605_v59, %v136_v61 }
 0x107   :  { %v846_v51 = vmul.f32 %v843_v45, %v590_v48 }
 0x109   :  { %v1694_v44 = vpop.eup %1693  ;;  %v848_v54 = vadd.f32 %v846_v51, %v779_v50 }
 0x10a   :  { %v853_v55 = vmul.f32 %v1694_v44, %v851_v40 }
 0x10b   :  { %1695 = vtanh.f32 %v848_v54 }
 0x10c   :  { %v857_v58 = vadd.f32 %v855_v56, %v853_v55 }
 0x10e   :  { %v861_v60 = vpack.c.bf16 %v857_v58, %v857_v58 }
 0x110   :  { %863 = vst [vmem:[#allocation2 + $0x8] sm:$0xf] %v861_v60 }
 0x111   :  { %v1696_v63 = vpop.eup %1695 }
 0x112   :  { %v854_v0 = vmul.f32 %v1696_v63, %v852_v62 }
 0x114   :  { %v858_v53 = vadd.f32 %v856_v43, %v854_v0 }
 0x116   :  { %v862_v1 = vpack.c.bf16 %v858_v53, %v858_v53 }
 0x117   :  { %v1461_v2 = vld [vmem:[#allocation2 + $0x8] sm:$0xf] }
 0x118   :  { %864 = vst [vmem:[#allocation2 + $0x14] sm:$0xf] %v862_v1 }
 0x11f   :  { %v1636_v3 = vld [vmem:[#allocation2 + $0x10] sm:$0xf0] }
 0x120   :  { %v1462_v4 = vor.u32 %v1636_v3, %v1461_v2 }
 0x122   :  { %1117 = vmatmul.bf16.vlgmr.msra.gmra.mxu3 %v1462_v4 }
 0x158   :  { %v1090_v6 = vpop.f32.mrf.mxu1 }
 0x159   :  { %v1091_v7 = vadd.f32 %v1676_v5, %v1090_v6 }
 0x160   :  { %v1092_v10 = vpop.f32.mrf.mxu1 }
 0x161   :  { %v1093_v13 = vadd.f32 %v1676_v5, %v1092_v10 }
 0x162   :  { %v1104_v8 = vpop.f32.mrf.mxu2 }
 0x163   :  { %v1105_v9 = vadd.f32 %v1104_v8, %v1091_v7 }
 0x16a   :  { %v1106_v14 = vpop.f32.mrf.mxu2 }
 0x16b   :  { %v1107_v15 = vadd.f32 %v1106_v14, %v1093_v13 }
 0x1a5   :  { %v1118_v11 = vpop.f32.mrf.mxu3 }
 0x1a6   :  { %v1119_v12 = vadd.f32 %v1118_v11, %v1105_v9 }
 0x1a8   :  { %1123 = vst [vmem:[#allocation14] sm:$0xff] %v1119_v12 }
 0x1ad   :  { %v1120_v16 = vpop.f32.mrf.mxu3 }
 0x1ae   :  { %v1121_v17 = vadd.f32 %v1120_v16, %v1107_v15 }
 0x1b0   :  { %1124 = vst [vmem:[#allocation14 + $0x8] sm:$0xff] %v1121_v17 }
 0x1b1   :  { %1137 = dma.vmem_to_hbm [thread:$0]  %s1130_s25, 256, %s1132_s28, [#allocation5], %s1876_s17, %s1876_s17, %s1877_s18  }
 0x1b2   :  { %1873 = dma.done.wait [#allocation5], 256  }
 0x1b3   :  { %1874 = vsyncadd [#allocation5], 4294967040 }
 0x1b4   :  { %1142 = vsyncpa [#allocation4], 1 }
 0x1b5   :  { %1143 = vsyncpa [#allocation7], 1 }
 0x1b6   :  { %1144 = vsyncpa [#allocation10], 1 }
 0x1b7   :  { %1145 = vsyncpa [#allocation13], 1 }
 0x1b8   :  { %1146 = vsyncpa [#allocation5], 1 }

</bundles_post_ra>
